<compile_context>
chip_gen: v5e
topology: v5e:2x2
jax: 0.10.0
libtpu: 0.0.40
codegen_flags: <defaults>
</compile_context>

<pallas_src>
import functools

import jax
import jax.numpy as jnp
from jax.experimental import pallas as pl
from jax.experimental.pallas import tpu as pltpu


def _round_up(n, m):
    return ((n + m - 1) // m) * m


def dueling_dqn_kernel(x_ref, w_ref, b_ref, out_ref, *, S, H, A):
    """One batch tile of the full Dueling-DQN forward (fc1->fc2->fused Q head)."""
    s_pad = _round_up(S, 8)

    x = x_ref[...]                                    # [TB, S]   bf16
    w1 = w_ref[:S, :H]                                # [S, H]    bf16
    w2 = w_ref[s_pad:, :H]                            # [H, H]    bf16
    wq = w_ref[s_pad:, H:H + A]                       # [H, A]    bf16 (fused dueling head)
    b1 = b_ref[0:1, :H]                               # [1, H]    f32
    b2 = b_ref[1:2, :H]                               # [1, H]    f32
    bq = b_ref[2:3, :A]                               # [1, A]    f32

    # fc1 + relu
    h1 = jnp.maximum(
        jnp.dot(x, w1, preferred_element_type=jnp.float32) + b1, 0.0)
    # fc2 + relu
    h2 = jnp.maximum(
        jnp.dot(h1.astype(jnp.bfloat16), w2,
                preferred_element_type=jnp.float32) + b2, 0.0)
    # fused dueling head: value + (adv - adv.mean) precomputed into wq / bq,
    # so one MXU pass produces Q directly.
    q = jnp.dot(h2.astype(jnp.bfloat16), wq,
                preferred_element_type=jnp.float32) + bq       # [TB, A]
    out_ref[...] = q.astype(out_ref.dtype)


def dueling_dqn_forward(x, w_slab, b_slab, *, block_b=1024):
    """x: [B, state_size] float32 -> Q-values [B, action_size] float32."""
    B, S = x.shape
    s_pad = _round_up(S, 8)
    H = w_slab.shape[0] - s_pad
    A = w_slab.shape[1] - H

    TB = min(block_b, _round_up(B, 8))
    Bp = _round_up(B, TB)
    xp = x if Bp == B else jnp.pad(x, ((0, Bp - B), (0, 0)))
    xp = xp.astype(jnp.bfloat16)

    kernel = functools.partial(dueling_dqn_kernel, S=S, H=H, A=A)
    out = pl.pallas_call(
        kernel,
        out_shape=jax.ShapeDtypeStruct((Bp, A), jnp.float32),
        grid=(pl.cdiv(Bp, TB),),
        in_specs=[
            pl.BlockSpec((TB, S), lambda i: (i, 0)),        # batch-tiled x
            pl.BlockSpec(w_slab.shape, lambda i: (0, 0)),   # resident weight slab
            pl.BlockSpec(b_slab.shape, lambda i: (0, 0)),   # resident bias slab
        ],
        out_specs=pl.BlockSpec((TB, A), lambda i: (i, 0)),
        compiler_params=pltpu.CompilerParams(
            dimension_semantics=("parallel",)),
    )(xp, w_slab, b_slab)
    return out[:B]


def init_params(key, state_size, action_size, hidden=24):
    """PyTorch-Linear-style init (uniform +/- 1/sqrt(fan_in)); weights stored
    transposed as (in_features, out_features)."""
    def linear(k, fan_in, fan_out):
        kw, kb = jax.random.split(k)
        bound = 1.0 / jnp.sqrt(float(fan_in))
        w = jax.random.uniform(kw, (fan_in, fan_out), jnp.float32, -bound, bound)
        b = jax.random.uniform(kb, (1, fan_out), jnp.float32, -bound, bound)
        return w, b

    k1, k2, k3, k4 = jax.random.split(key, 4)
    w1, b1 = linear(k1, state_size, hidden)
    w2, b2 = linear(k2, hidden, hidden)
    wv, bv = linear(k3, hidden, 1)
    wa, ba = linear(k4, hidden, action_size)
    return (w1, b1, w2, b2, wv, bv, wa, ba)


def pack_params(params, state_size, action_size, hidden=24):
    """Pack the 8 Linear params into one bf16 weight slab + one f32 bias slab.

    The dueling combine is linear in h2, so it is folded into the head:
      wq = wv + wa - mean_a(wa)   (broadcast wv over the A columns)
      bq = bv + ba - mean_a(ba)

    Weight slab [s_pad + H, H + A]:
      rows [0:S)          , cols [0:H)   -> w1
      rows [s_pad:s_pad+H), cols [0:H)   -> w2
      rows [s_pad:s_pad+H), cols [H:H+A) -> wq (fused dueling head)
    Bias slab [3, max(H, A)]: rows = b1, b2, bq.
    """
    w1, b1, w2, b2, wv, bv, wa, ba = params
    S, H, A = state_size, hidden, action_size
    s_pad = _round_up(S, 8)

    # Fuse the dueling head in f32 before the bf16 cast.
    wq = wv + wa - wa.mean(axis=1, keepdims=True)   # [H, A]
    bq = bv + ba - ba.mean(axis=1, keepdims=True)   # [1, A]

    w_slab = jnp.zeros((s_pad + H, H + A), jnp.float32)
    w_slab = w_slab.at[:S, :H].set(w1)
    w_slab = w_slab.at[s_pad:, :H].set(w2)
    w_slab = w_slab.at[s_pad:, H:].set(wq)

    bw = max(H, A)
    b_slab = jnp.zeros((3, bw), jnp.float32)
    b_slab = b_slab.at[0, :H].set(b1[0])
    b_slab = b_slab.at[1, :H].set(b2[0])
    b_slab = b_slab.at[2, :A].set(bq[0])

    return w_slab.astype(jnp.bfloat16), b_slab


def reference_forward(x, params):
    """Pure f32 JAX reference matching the PyTorch module."""
    w1, b1, w2, b2, wv, bv, wa, ba = params
    h1 = jnp.maximum(x @ w1 + b1, 0.0)
    h2 = jnp.maximum(h1 @ w2 + b2, 0.0)
    value = h2 @ wv + bv
    adv = h2 @ wa + ba
    return value + (adv - adv.mean(axis=1, keepdims=True))


if __name__ == "__main__":
    state_size = 4      # CartPole observation dim
    action_size = 2     # CartPole action dim
    hidden = 24
    batch = 8

    key = jax.random.PRNGKey(0)
    kx, kp = jax.random.split(key)
    x = jax.random.normal(kx, (batch, state_size), jnp.float32)
    params = init_params(kp, state_size, action_size, hidden)
    w_slab, b_slab = pack_params(params, state_size, action_size, hidden)

    out = dueling_dqn_forward(x, w_slab, b_slab)
    out = jax.block_until_ready(out)

    ref = reference_forward(x, params)
    assert out.shape == (batch, action_size)
    # bf16 matmul operands (f32 accumulate) -> loosened tolerance vs f32 ref.
    assert jnp.allclose(out, ref, atol=5e-2, rtol=5e-2), (out, ref)

    print("KERNEL_OK")
</pallas_src>

<mosaic_0001>
module attributes {stable_mosaic.version = 11 : i64} {
  func.func @dueling_dqn_kernel(%arg0: i32, %arg1: memref<8x4xbf16, #tpu.memory_space<vmem>>, %arg2: memref<32x26xbf16, #tpu.memory_space<vmem>>, %arg3: memref<3x24xf32, #tpu.memory_space<vmem>>, %arg4: memref<8x2xf32, #tpu.memory_space<vmem>>) attributes {dimension_semantics = [#tpu.dimension_semantics<parallel>], iteration_bounds = array<i64: 1>, scalar_prefetch = 0 : i64, scratch_operands = 0 : i64, tpu.core_type = #tpu.core_type<tc>, window_params = [{transform_indices = @transform_0, window_bounds = array<i64: 8, 4>}, {pipeline_mode = #tpu.pipeline_mode<synchronous>, transform_indices = @transform_1, window_bounds = array<i64: 32, 26>}, {pipeline_mode = #tpu.pipeline_mode<synchronous>, transform_indices = @transform_2, window_bounds = array<i64: 3, 24>}, {transform_indices = @transform_3, window_bounds = array<i64: 8, 2>}]} {
    %c0 = arith.constant 0 : index
    %c0_0 = arith.constant 0 : index
    %0 = vector.load %arg1[%c0, %c0_0] : memref<8x4xbf16, #tpu.memory_space<vmem>>, vector<8x4xbf16>
    %c0_1 = arith.constant 0 : index
    %c0_2 = arith.constant 0 : index
    %1 = vector.load %arg2[%c0_1, %c0_2] : memref<32x26xbf16, #tpu.memory_space<vmem>>, vector<4x24xbf16>
    %c8 = arith.constant 8 : index
    %c0_3 = arith.constant 0 : index
    %2 = vector.load %arg2[%c8, %c0_3] : memref<32x26xbf16, #tpu.memory_space<vmem>>, vector<24x24xbf16>
    %c8_4 = arith.constant 8 : index
    %c24 = arith.constant 24 : index
    %3 = vector.load %arg2[%c8_4, %c24] : memref<32x26xbf16, #tpu.memory_space<vmem>>, vector<24x2xbf16>
    %c0_5 = arith.constant 0 : index
    %c0_6 = arith.constant 0 : index
    %4 = vector.load %arg3[%c0_5, %c0_6] : memref<3x24xf32, #tpu.memory_space<vmem>>, vector<1x24xf32>
    %c1 = arith.constant 1 : index
    %c0_7 = arith.constant 0 : index
    %5 = vector.load %arg3[%c1, %c0_7] : memref<3x24xf32, #tpu.memory_space<vmem>>, vector<1x24xf32>
    %c2 = arith.constant 2 : index
    %c0_8 = arith.constant 0 : index
    %6 = vector.load %arg3[%c2, %c0_8] : memref<3x24xf32, #tpu.memory_space<vmem>>, vector<1x2xf32>
    %cst = arith.constant dense<0.000000e+00> : vector<8x24xf32>
    %7 = tpu.matmul %0, %1, %cst {dimension_numbers = #tpu.dot_dimension_numbers<[1], [0], [0], [1], [0, 0, 1, 1], [], []>} : vector<8x4xbf16>, vector<4x24xbf16>, vector<8x24xf32> -> vector<8x24xf32>
    %8 = vector.broadcast %4 : vector<1x24xf32> to vector<8x24xf32>
    %9 = arith.addf %7, %8 : vector<8x24xf32>
    %cst_9 = arith.constant 0.000000e+00 : f32
    %10 = vector.broadcast %cst_9 : f32 to vector<8x24xf32>
    %11 = arith.maximumf %9, %10 : vector<8x24xf32>
    %12 = arith.truncf %11 : vector<8x24xf32> to vector<8x24xbf16>
    %cst_10 = arith.constant dense<0.000000e+00> : vector<8x24xf32>
    %13 = tpu.matmul %12, %2, %cst_10 {dimension_numbers = #tpu.dot_dimension_numbers<[1], [0], [0], [1], [0, 0, 1, 1], [], []>} : vector<8x24xbf16>, vector<24x24xbf16>, vector<8x24xf32> -> vector<8x24xf32>
    %14 = vector.broadcast %5 : vector<1x24xf32> to vector<8x24xf32>
    %15 = arith.addf %13, %14 : vector<8x24xf32>
    %cst_11 = arith.constant 0.000000e+00 : f32
    %16 = vector.broadcast %cst_11 : f32 to vector<8x24xf32>
    %17 = arith.maximumf %15, %16 : vector<8x24xf32>
    %18 = arith.truncf %17 : vector<8x24xf32> to vector<8x24xbf16>
    %cst_12 = arith.constant dense<0.000000e+00> : vector<8x2xf32>
    %19 = tpu.matmul %18, %3, %cst_12 {dimension_numbers = #tpu.dot_dimension_numbers<[1], [0], [0], [1], [0, 0, 1, 1], [], []>} : vector<8x24xbf16>, vector<24x2xbf16>, vector<8x2xf32> -> vector<8x2xf32>
    %20 = vector.broadcast %6 : vector<1x2xf32> to vector<8x2xf32>
    %21 = arith.addf %19, %20 : vector<8x2xf32>
    %c0_13 = arith.constant 0 : index
    %c0_14 = arith.constant 0 : index
    %22 = vector.load %arg4[%c0_13, %c0_14] : memref<8x2xf32, #tpu.memory_space<vmem>>, vector<8x2xf32>
    tpu.vector_store %arg4[%c0_13, %c0_14], %21 {strides = array<i32>} : memref<8x2xf32, #tpu.memory_space<vmem>>, vector<8x2xf32>,
    return
  }
  func.func @transform_0(%arg0: i32) -> (i32, i32) {
    %c0_i32 = arith.constant 0 : i32
    %c0_i32_0 = arith.constant 0 : i32
    return %arg0, %c0_i32 : i32, i32
  }
  func.func @transform_1(%arg0: i32) -> (i32, i32) {
    %c0_i32 = arith.constant 0 : i32
    %c0_i32_0 = arith.constant 0 : i32
    %c0_i32_1 = arith.constant 0 : i32
    return %c0_i32, %c0_i32_0 : i32, i32
  }
  func.func @transform_2(%arg0: i32) -> (i32, i32) {
    %c0_i32 = arith.constant 0 : i32
    %c0_i32_0 = arith.constant 0 : i32
    %c0_i32_1 = arith.constant 0 : i32
    return %c0_i32, %c0_i32_0 : i32, i32
  }
  func.func @transform_3(%arg0: i32) -> (i32, i32) {
    %c0_i32 = arith.constant 0 : i32
    %c0_i32_0 = arith.constant 0 : i32
    return %arg0, %c0_i32 : i32, i32
  }
}

</mosaic_0001>

<bundles_post_ra>
// kernel: tpu_custom_call.1
= control target key start
LH: loop header
LB: loop body
LE: loop exit
PB: predicated region body
PF: predicated region fallthrough
CT: control target
= control target key end

     0   :  { %8 = vsyncpa [#allocation3], 0  ;;  %s169_s15 = smov [#allocation2]   ;;  %s170_s17 = smov 64   ;;  %s213_s0 = inlined_call_operand.vmem [shape: bf16[8,4], index: 0, kind: input, shape index: {}]   ;;  %s214_s1 = inlined_call_operand.hbm [shape: bf16[32,26], index: 1, kind: input, shape index: {}]   ;;  %s215_s2 = inlined_call_operand.vmem [shape: f32[3,24], index: 2, kind: input, shape index: {}]   ;;  %s216_s3 = inlined_call_operand.vmem [shape: f32[8,2], index: 3, kind: output, shape index: {}]  }
   0x1   :  { %s15_s14 = sshll.u32 %s214_s1, 4  ;;  %s17_s16 = sshll.u32 %s169_s15, 4  ;;  %s16_s14 = int_to_ptr.hbm [resolvable:$true] %s15_s14  ;;  %s18_s16 = int_to_ptr.vmem [resolvable:$true] %s17_s16 }
   0x2   :  { %s171_s18 = smov 4  }
   0x3   :  { %23 = dma.hbm_to_vmem [thread:$0]  %s16_s14, 256, %s18_s16, [#allocation3], %s170_s17, %s170_s17, %s171_s18  }
   0x4   :  { %167 = dma.done.wait [#allocation3], 256  }
   0x5   :  { %168 = vsyncadd [#allocation3], 4294967040  ;;  %vm44_vm0 = vcmask 1041408   ;;  %v32_v0 = vld [vmem:[#allocation2] sm:$0x3]  ;;  %vm40_vm1 = vcmask 31744  }
   0x6   :  { %v46_v1 = vsel %vm44_vm0, %v32_v0, 0  ;;  %v31_v2 = vld [vmem:[%s213_s0] sm:$0xf]  ;;  %v35_v3 = vld [vmem:[#allocation2 + $0xc] sm:$0xf]  ;;  %vm77_vm2 = vcmask 1043456  }
   0x7   :  { %55 = vmatpush.bf16.msra.mxu0 %v46_v1  ;;  %v69_v4 = vunpack.c.l.b16 %v35_v3  ;;  %s172_s1 = smov 104   ;;  %v135_v7 = vld [vmem:[#allocation2 + $0x4] sm:$0xff]  ;;  %v140_v8 = vld [vmem:[%s215_s2] ss:$0 sm:$0xff]  ;;  %vm73_vm3 = vcmask 195584   ;;  %vm121_vm4 = vcmask 15360  }
   0x8   :  { %v141_v17 = vld [vmem:[%s215_s2 + $0x1] ss:$0 sm:$0xff]  ;;  %v142_v23 = vld [vmem:[%s215_s2 + $0x2] ss:$0 sm:$0xff] }
   0x9   :  { %v71_v5 = vpack.c.b16 %v69_v4, %v69_v4 }
   0xa   :  { %128 = vmatmul.msk.bf16.vlgmr.msra.gmra.mxu0 %vm40_vm1, %v31_v2 }
   0xb   :  { %v79_v6 = vsel %vm77_vm2, %v71_v5, 0  ;;  %99 = vrot.lane.b32.xlu0 %v71_v5, %s172_s1 }
   0xc   :  { %87 = vmatpush.bf16.msra.mxu1 %v79_v6 }
  0x10   :  { %88 = vmatpush.bf16.msra.mxu1 %v135_v7 }
  0x13   :  { %97 = vrot.lane.b32.xlu0 %v135_v7, %s172_s1 }
  0x7d   :  { %v100_v14 = vpop.permute.xlu0 %99 }
  0x7e   :  { %v106_v15 = vsel %vm77_vm2, %v100_v14, 0 }
  0x7f   :  { %114 = vmatpush.bf16.msra.mxu2 %v106_v15 }
  0x85   :  { %v98_v16 = vpop.permute.xlu0 %97 }
  0x86   :  { %115 = vmatpush.bf16.msra.mxu2 %v98_v16 }
  0x87   :  { %v57_v9 = vpop.f32.mrf.mxu0 }
  0x88   :  { %v58_v10 = vadd.f32 %v140_v8, %v57_v9 }
  0x8a   :  { %v61_v11 = vmax.f32 %v58_v10, 0.0 }
  0x8c   :  { %v62_v12 = vpack.c.bf16 %v61_v11, %v61_v11 }
  0x8e   :  { %133 = vmatmul.msk.bf16.vlgmr.msra.gmra.mxu1 %vm73_vm3, %v62_v12 }
  0x8f   :  { %v59_v13 = vpop.f32.mrf.mxu0 }
 0x10b   :  { %v90_v18 = vpop.f32.mrf.mxu1 }
 0x10c   :  { %v91_v19 = vadd.f32 %v141_v17, %v90_v18 }
 0x10e   :  { %v94_v20 = vmax.f32 %v91_v19, 0.0 }
 0x110   :  { %v95_v21 = vpack.c.bf16 %v94_v20, %v94_v20 }
 0x112   :  { %134 = vmatmul.msk.bf16.vlgmr.msra.gmra.mxu2 %vm73_vm3, %v95_v21 }
 0x113   :  { %v92_v22 = vpop.f32.mrf.mxu1 }
 0x195   :  { %v117_v24 = vpop.f32.mrf.mxu2 }
 0x196   :  { %v118_v25 = vadd.f32 %v142_v23, %v117_v24 }
 0x198   :  { %122 = vst.msk [vmem:[%s216_s3] sm:$0xff] %vm121_vm4, %v118_v25 }
 0x19d   :  { %v119_v26 = vpop.f32.mrf.mxu2 }
 0x19e   :  { %127 = vsyncpa [#allocation3], 1 }

</bundles_post_ra>
